<compile_context>
chip_gen: v5e
topology: v5e:2x2
jax: 0.10.0
libtpu: 0.0.40
codegen_flags: <defaults>
</compile_context>

<pallas_src>
import functools
import math

import jax
import jax.numpy as jnp
from jax import lax
from jax.experimental import pallas as pl
from jax.experimental.pallas import tpu as pltpu

MASK_VALUE = -1e30   # finite "minus infinity": keeps online softmax NaN-free


def _round_up(a, m):
    return (a + m - 1) // m * m


def _device_defaults():
    """(block size, vmem_limit_bytes) per TPU generation (perf feedback)."""
    try:
        kind = jax.devices()[0].device_kind.lower()
    except Exception:
        kind = ""
    if "v7" in kind:
        # 64 MiB physical VMEM / TC: keep 256 tiles + default scoped limit.
        return 256, None
    if "v5" in kind or "v6" in kind:
        # 128 MiB physical VMEM: larger tiles recover HBM efficiency; raise the
        # scoped-VMEM limit so the bigger double-buffered blocks fit.
        return 512, 96 * 1024 * 1024
    return 256, None


def _pick_col_tile(total_cols, target=1024):
    """Largest multiple of 128 that divides total_cols and is <= target."""
    if total_cols <= target:
        return total_cols
    for tn in range((target // 128) * 128, 0, -128):
        if total_cols % tn == 0:
            return tn
    return total_cols


# --------------------------------------------------------------------------- #
# Kernels
# --------------------------------------------------------------------------- #
def qkv_fused_kernel(x_ref, w_ref, b_ref, q_ref, k_ref, v_ref, *, hidden_dim):
    """QKV projection, resident (H, 3H) weight, three separate outputs."""
    acc = jnp.dot(x_ref[...], w_ref[...], preferred_element_type=jnp.float32)
    acc = acc + b_ref[...]
    q_ref[...] = acc[:, :hidden_dim].astype(q_ref.dtype)
    k_ref[...] = acc[:, hidden_dim:2 * hidden_dim].astype(k_ref.dtype)
    v_ref[...] = acc[:, 2 * hidden_dim:].astype(v_ref.dtype)


def qkv_coltile_kernel(x_ref, w_ref, b_ref, qkv_ref):
    """QKV projection with the (H, 3H) weight N-tiled; one fused output."""
    qkv_ref[...] = (jnp.dot(x_ref[...], w_ref[...],
                            preferred_element_type=jnp.float32)
                    + b_ref[...]).astype(qkv_ref.dtype)


def flash_attn_kernel(kv_lo_ref, kv_hi_ref,
                      q_ref, k_ref, v_ref, segq_ref, segk_ref, wo_ref, bo_ref,
                      o_ref, ml_sc, acc_sc, *, num_heads, head_dim):
    # q_ref: (Tq, H) bf16 (already scaled by 1/sqrt(d) via the fused Wq)
    # k_ref/v_ref: (Tk, H) bf16; segq_ref: (Tq, 1) i32; segk_ref: (1, Tk) i32
    # ml_sc: (Tq, 2*num_heads) f32 -> columns [0:nh] = m, [nh:2nh] = l
    # acc_sc: (Tq, H) f32
    qi = pl.program_id(0)
    ki = pl.program_id(1)
    nh, d = num_heads, head_dim

    @pl.when(ki == 0)
    def _init():
        bq = ml_sc.shape[0]
        ml_sc[...] = jnp.concatenate(
            [jnp.full((bq, nh), MASK_VALUE, jnp.float32),
             jnp.zeros((bq, nh), jnp.float32)], axis=1)
        acc_sc[...] = jnp.zeros(acc_sc.shape, acc_sc.dtype)

    # block-diagonal skip: only kv tiles that can share a segment with this
    # q tile do any work (their index_map is also clamped, so skipped tiles
    # are not even DMA'd).
    in_range = jnp.logical_and(ki >= kv_lo_ref[qi], ki <= kv_hi_ref[qi])

    @pl.when(in_range)
    def _compute():
        q = q_ref[...]
        k = k_ref[...]
        v = v_ref[...]
        # mask hoisted out of the head loop: one select per grid step.
        bias = jnp.where(segq_ref[...] == segk_ref[...],
                         0.0, MASK_VALUE).astype(jnp.float32)      # (Tq, Tk)
        ml = ml_sc[...]
        acc = acc_sc[...]
        m_cols, l_cols, acc_cols = [], [], []
        # TODO(synk): for num_heads >= 16 switch to lax.fori_loop(unroll=4)
        # (or a head grid axis when head_dim % 128 == 0) to bound vreg live
        # ranges; static unroll is fine for small head counts.
        for h in range(nh):
            lo = h * d
            qh = q[:, lo:lo + d]
            kh = k[:, lo:lo + d]
            vh = v[:, lo:lo + d]
            # NT contraction straight on the MXU -- no .T relayout per head.
            s = lax.dot_general(qh, kh, (((1,), (1,)), ((), ())),
                                preferred_element_type=jnp.float32) + bias
            m_prev = ml[:, h:h + 1]                                # (Tq, 1)
            l_prev = ml[:, nh + h:nh + h + 1]
            m_new = jnp.maximum(m_prev, jnp.max(s, axis=-1, keepdims=True))
            alpha = jnp.exp(m_prev - m_new)
            p = jnp.exp(s - m_new)                                 # f32
            l_cols.append(alpha * l_prev + jnp.sum(p, axis=-1, keepdims=True))
            acc_cols.append(alpha * acc[:, lo:lo + d]
                            + jnp.dot(p.astype(vh.dtype), vh,
                                      preferred_element_type=jnp.float32))
            m_cols.append(m_new)
        # single lane-dense scratch stores (no per-head masked RMW).
        ml_sc[...] = jnp.concatenate(m_cols + l_cols, axis=1)
        acc_sc[...] = jnp.concatenate(acc_cols, axis=1)

    @pl.when(ki == pl.num_programs(1) - 1)
    def _finalize():
        ml = ml_sc[...]
        acc = acc_sc[...]
        outs = []
        for h in range(nh):
            inv_l = pl.reciprocal(ml[:, nh + h:nh + h + 1], approx=True)
            outs.append(acc[:, h * d:(h + 1) * d] * inv_l)
        attn = jnp.concatenate(outs, axis=1).astype(wo_ref.dtype)  # (Tq, H)
        # fused output projection: one lane-dense (Tq, H) store, no extra
        # (Tpad, H) HBM round trip for the attention output.
        # TODO(synk): for very large H the resident (H, H) Wo needs N-tiling.
        o_ref[...] = (jnp.dot(attn, wo_ref[...],
                              preferred_element_type=jnp.float32)
                      + bo_ref[...]).astype(o_ref.dtype)


# --------------------------------------------------------------------------- #
# Wrapper
# --------------------------------------------------------------------------- #
def flash_bidirectional_attention_block(x, cu_seqlens, max_seqlen, params,
                                        num_heads, block_q=None, block_kv=None,
                                        force_qkv_col_tile=None):
    """Forward pass matching the PyTorch module (dropout=0.0 -> identity)."""
    del max_seqlen   # varlen semantics reproduced via the segment-id mask
    T, H = x.shape
    assert H % num_heads == 0
    d = H // num_heads
    wq, bq, wk, bk, wv, bv, wo, bo = params
    assert int(cu_seqlens[0]) == 0 and int(cu_seqlens[-1]) == T, (
        "cu_seqlens must start at 0 and end at total_seq_len")
    scale = 1.0 / math.sqrt(d)

    # ---- generation-dependent tile sizes / scoped-VMEM limit ----------------
    default_block, vmem_limit = _device_defaults()
    if block_q is None:
        block_q = min(default_block, _round_up(T, 8))
    if block_kv is None:
        block_kv = min(default_block, _round_up(T, 8))
    Tpad = _round_up(T, math.lcm(block_q, block_kv))
    n_tok = Tpad // block_q
    n_kv = Tpad // block_kv

    # ---- one-time host-side weight prep --------------------------------------
    w_qkv = jnp.concatenate([wq.T * scale, wk.T, wv.T], axis=1).astype(jnp.bfloat16)
    b_qkv = jnp.concatenate([bq * scale, bk, bv]).reshape(1, 3 * H).astype(jnp.float32)
    wo_bf = wo.T.astype(jnp.bfloat16)
    bo2 = bo.reshape(1, H).astype(jnp.float32)

    # ---- pad tokens to a tile multiple; padding gets its own segment id ------
    xp = x if Tpad == T else jnp.pad(x, ((0, Tpad - T), (0, 0)))
    xp_bf = xp.astype(jnp.bfloat16)
    positions = jnp.arange(Tpad, dtype=jnp.int32)
    seg = (jnp.searchsorted(cu_seqlens.astype(jnp.int32), positions,
                            side="right") - 1).astype(jnp.int32)
    segq = seg.reshape(Tpad, 1)
    segk = seg.reshape(1, Tpad)

    # per-tile segment ranges -> contiguous kv block window [kv_lo, kv_hi] per
    # q tile (packed varlen attention is block-diagonal).
    q_smin = seg.reshape(n_tok, block_q).min(axis=1)
    q_smax = seg.reshape(n_tok, block_q).max(axis=1)
    k_smin = seg.reshape(n_kv, block_kv).min(axis=1)
    k_smax = seg.reshape(n_kv, block_kv).max(axis=1)
    overlap = ((q_smin[:, None] <= k_smax[None, :]) &
               (k_smin[None, :] <= q_smax[:, None]))                # (n_tok, n_kv)
    kv_lo = jnp.argmax(overlap, axis=1).astype(jnp.int32)
    kv_hi = (n_kv - 1 - jnp.argmax(overlap[:, ::-1], axis=1)).astype(jnp.int32)

    # ---- 1) fused QKV projection ---------------------------------------------
    col_tile = force_qkv_col_tile
    if col_tile is None and H % 128 == 0 and (w_qkv.size * 2) > 12 * 1024 * 1024:
        col_tile = _pick_col_tile(3 * H)        # N-tile big weights (v7x VMEM)
    use_fused_qkv = col_tile is not None

    if use_fused_qkv:
        assert H % 128 == 0 and (3 * H) % col_tile == 0 and col_tile % 128 == 0
        n_col = (3 * H) // col_tile
        qkv = pl.pallas_call(
            qkv_coltile_kernel,
            out_shape=jax.ShapeDtypeStruct((Tpad, 3 * H), jnp.bfloat16),
            grid=(n_tok, n_col),
            in_specs=[pl.BlockSpec((block_q, H), lambda i, j: (i, 0)),
                      pl.BlockSpec((H, col_tile), lambda i, j: (0, j)),
                      pl.BlockSpec((1, col_tile), lambda i, j: (0, j))],
            out_specs=pl.BlockSpec((block_q, col_tile), lambda i, j: (i, j)),
            compiler_params=pltpu.CompilerParams(
                dimension_semantics=("parallel", "parallel"),
                vmem_limit_bytes=vmem_limit),
        )(xp_bf, w_qkv, b_qkv)
        q_arr = k_arr = v_arr = qkv             # same buffer, 3 column windows
        q_col, k_col, v_col = 0, 1, 2
    else:
        # small weight: keep it VMEM-resident, emit separate q/k/v arrays
        # (needed anyway when H is not a multiple of 128).
        q_arr, k_arr, v_arr = pl.pallas_call(
            functools.partial(qkv_fused_kernel, hidden_dim=H),
            out_shape=tuple(jax.ShapeDtypeStruct((Tpad, H), jnp.bfloat16)
                            for _ in range(3)),
            grid=(n_tok,),
            in_specs=[pl.BlockSpec((block_q, H), lambda i: (i, 0)),
                      pl.BlockSpec((H, 3 * H), lambda i: (0, 0)),
                      pl.BlockSpec((1, 3 * H), lambda i: (0, 0))],
            out_specs=tuple(pl.BlockSpec((block_q, H), lambda i: (i, 0))
                            for _ in range(3)),
            compiler_params=pltpu.CompilerParams(
                dimension_semantics=("parallel",),
                vmem_limit_bytes=vmem_limit),
        )(xp_bf, w_qkv, b_qkv)
        q_col = k_col = v_col = 0

    # ---- 2) flash attention + fused output projection -------------------------
    def _q_map(col):
        def m(qi, ki, lo_ref, hi_ref):
            return (qi, col)
        return m

    def _kv_map(col):
        def m(qi, ki, lo_ref, hi_ref):
            # clamp into the overlapping window: skipped tiles re-use the
            # already-resident block, so no DMA is issued for them.
            kk = jnp.minimum(jnp.maximum(ki, lo_ref[qi]), hi_ref[qi])
            return (kk, col)
        return m

    def _segq_map(qi, ki, lo_ref, hi_ref):
        return (qi, 0)

    def _segk_map(qi, ki, lo_ref, hi_ref):
        kk = jnp.minimum(jnp.maximum(ki, lo_ref[qi]), hi_ref[qi])
        return (0, kk)

    def _resident_map(qi, ki, lo_ref, hi_ref):
        return (0, 0)

    def _out_map(qi, ki, lo_ref, hi_ref):
        return (qi, 0)

    # TODO(synk): if kv DMA latency shows up (short per-step compute after the
    # block skip), add pipeline_mode=pl.Buffered(3) to the k/v specs on v5e/v6e.
    grid_spec = pltpu.PrefetchScalarGridSpec(
        num_scalar_prefetch=2,
        grid=(n_tok, n_kv),
        in_specs=[pl.BlockSpec((block_q, H), _q_map(q_col)),
                  pl.BlockSpec((block_kv, H), _kv_map(k_col)),
                  pl.BlockSpec((block_kv, H), _kv_map(v_col)),
                  pl.BlockSpec((block_q, 1), _segq_map),
                  pl.BlockSpec((1, block_kv), _segk_map),
                  pl.BlockSpec((H, H), _resident_map),
                  pl.BlockSpec((1, H), _resident_map)],
        out_specs=pl.BlockSpec((block_q, H), _out_map),
        scratch_shapes=[pltpu.VMEM((block_q, 2 * num_heads), jnp.float32),  # m|l
                        pltpu.VMEM((block_q, H), jnp.float32)],             # acc
    )
    out = pl.pallas_call(
        functools.partial(flash_attn_kernel, num_heads=num_heads, head_dim=d),
        out_shape=jax.ShapeDtypeStruct((Tpad, H), jnp.float32),
        grid_spec=grid_spec,
        compiler_params=pltpu.CompilerParams(
            dimension_semantics=("parallel", "arbitrary"),
            vmem_limit_bytes=vmem_limit),
    )(kv_lo, kv_hi, q_arr, k_arr, v_arr, segq, segk, wo_bf, bo2)

    # dropout(p=0.0) == nn.Identity -> no-op
    return out[:T] if Tpad != T else out


# --------------------------------------------------------------------------- #
# Pure-JAX reference (mirrors the PyTorch forward) for a correctness check
# --------------------------------------------------------------------------- #
def reference_forward(x, cu_seqlens, params, num_heads):
    T, H = x.shape
    d = H // num_heads
    wq, bq, wk, bk, wv, bv, wo, bo = params
    q = (x @ wq.T + bq).reshape(T, num_heads, d)
    k = (x @ wk.T + bk).reshape(T, num_heads, d)
    v = (x @ wv.T + bv).reshape(T, num_heads, d)
    positions = jnp.arange(T)
    seg = jnp.searchsorted(cu_seqlens, positions, side="right") - 1
    mask = seg[:, None] == seg[None, :]
    s = jnp.einsum("qhd,khd->hqk", q, k) / math.sqrt(d)
    s = jnp.where(mask[None], s, -jnp.inf)
    p = jax.nn.softmax(s, axis=-1)
    o = jnp.einsum("hqk,khd->qhd", p, v).reshape(T, H)
    return o @ wo.T + bo


def init_params(key, hidden_dim):
    keys = jax.random.split(key, 8)
    bound = 1.0 / math.sqrt(hidden_dim)

    def lin(kw, kb):
        W = jax.random.uniform(kw, (hidden_dim, hidden_dim), jnp.float32, -bound, bound)
        b = jax.random.uniform(kb, (hidden_dim,), jnp.float32, -bound, bound)
        return W, b

    wq, bq = lin(keys[0], keys[1])
    wk, bk = lin(keys[2], keys[3])
    wv, bv = lin(keys[4], keys[5])
    wo, bo = lin(keys[6], keys[7])
    return (wq, bq, wk, bk, wv, bv, wo, bo)


if __name__ == "__main__":
    # ---- config 1: small H, resident-weight path, exercises padding + the
    # block-diagonal skip + a fully-masked leading kv tile for some q rows ----
    hidden_dim = 32
    num_heads = 4
    cu_seqlens = jnp.array([0, 30, 100, 160, 250], dtype=jnp.int32)
    max_seqlen = 90
    total_seq_len = int(cu_seqlens[-1])

    key = jax.random.PRNGKey(0)
    kx, kp = jax.random.split(key)
    x = jax.random.normal(kx, (total_seq_len, hidden_dim), dtype=jnp.float32)
    params = init_params(kp, hidden_dim)

    out = flash_bidirectional_attention_block(
        x, cu_seqlens, max_seqlen, params, num_heads,
        block_q=64, block_kv=128)
    out = jax.block_until_ready(out)
    ref = reference_forward(x, cu_seqlens, params, num_heads)
    assert out.shape == (total_seq_len, hidden_dim)
    err = float(jnp.max(jnp.abs(out - ref)))
    assert jnp.allclose(out, ref, atol=3e-2, rtol=3e-2), (
        f"config1 mismatch vs reference: max |diff| = {err}")

    # ---- config 2: H % 128 == 0, exercises the N-tiled fused-QKV path and the
    # attention reading q/k/v as column windows of one fused array ------------
    hidden_dim2 = 128
    num_heads2 = 2
    cu_seqlens2 = jnp.array([0, 100, 160, 256], dtype=jnp.int32)
    total2 = int(cu_seqlens2[-1])
    kx2, kp2 = jax.random.split(jax.random.PRNGKey(1))
    x2 = jax.random.normal(kx2, (total2, hidden_dim2), dtype=jnp.float32)
    params2 = init_params(kp2, hidden_dim2)

    out2 = flash_bidirectional_attention_block(
        x2, cu_seqlens2, 100, params2, num_heads2,
        block_q=128, block_kv=128, force_qkv_col_tile=128)
    out2 = jax.block_until_ready(out2)
    ref2 = reference_forward(x2, cu_seqlens2, params2, num_heads2)
    err2 = float(jnp.max(jnp.abs(out2 - ref2)))
    assert jnp.allclose(out2, ref2, atol=5e-2, rtol=5e-2), (
        f"config2 mismatch vs reference: max |diff| = {err2}")

    print("KERNEL_OK")
</pallas_src>

<mosaic_0001>
module attributes {stable_mosaic.version = 11 : i64} {
  func.func @qkv_fused_kernel(%arg0: i32, %arg1: memref<64x32xbf16, #tpu.memory_space<vmem>>, %arg2: memref<32x96xbf16, #tpu.memory_space<vmem>>, %arg3: memref<1x96xf32, #tpu.memory_space<vmem>>, %arg4: memref<64x32xbf16, #tpu.memory_space<vmem>>, %arg5: memref<64x32xbf16, #tpu.memory_space<vmem>>, %arg6: memref<64x32xbf16, #tpu.memory_space<vmem>>) attributes {dimension_semantics = [#tpu.dimension_semantics<parallel>], iteration_bounds = array<i64: 4>, scalar_prefetch = 0 : i64, scratch_operands = 0 : i64, tpu.core_type = #tpu.core_type<tc>, window_params = [{transform_indices = @transform_0, window_bounds = array<i64: 64, 32>}, {pipeline_mode = #tpu.pipeline_mode<synchronous>, transform_indices = @transform_1, window_bounds = array<i64: 32, 96>}, {pipeline_mode = #tpu.pipeline_mode<synchronous>, transform_indices = @transform_2, window_bounds = array<i64: 1, 96>}, {transform_indices = @transform_3, window_bounds = array<i64: 64, 32>}, {transform_indices = @transform_4, window_bounds = array<i64: 64, 32>}, {transform_indices = @transform_5, window_bounds = array<i64: 64, 32>}]} {
    %c0 = arith.constant 0 : index
    %c0_0 = arith.constant 0 : index
    %0 = vector.load %arg1[%c0, %c0_0] : memref<64x32xbf16, #tpu.memory_space<vmem>>, vector<64x32xbf16>
    %c0_1 = arith.constant 0 : index
    %c0_2 = arith.constant 0 : index
    %1 = vector.load %arg2[%c0_1, %c0_2] : memref<32x96xbf16, #tpu.memory_space<vmem>>, vector<32x96xbf16>
    %cst = arith.constant dense<0.000000e+00> : vector<64x96xf32>
    %2 = tpu.matmul %0, %1, %cst {dimension_numbers = #tpu.dot_dimension_numbers<[1], [0], [0], [1], [0, 0, 1, 1], [], []>} : vector<64x32xbf16>, vector<32x96xbf16>, vector<64x96xf32> -> vector<64x96xf32>
    %c0_3 = arith.constant 0 : index
    %c0_4 = arith.constant 0 : index
    %3 = vector.load %arg3[%c0_3, %c0_4] : memref<1x96xf32, #tpu.memory_space<vmem>>, vector<1x96xf32>
    %4 = vector.broadcast %3 : vector<1x96xf32> to vector<64x96xf32>
    %5 = arith.addf %2, %4 : vector<64x96xf32>
    %6 = vector.extract_strided_slice %5 {offsets = [0, 0], sizes = [64, 32], strides = [1, 1]} : vector<64x96xf32> to vector<64x32xf32>
    %7 = arith.truncf %6 : vector<64x32xf32> to vector<64x32xbf16>
    %c0_5 = arith.constant 0 : index
    %c0_6 = arith.constant 0 : index
    %8 = vector.load %arg4[%c0_5, %c0_6] : memref<64x32xbf16, #tpu.memory_space<vmem>>, vector<64x32xbf16>
    tpu.vector_store %arg4[%c0_5, %c0_6], %7 {strides = array<i32>} : memref<64x32xbf16, #tpu.memory_space<vmem>>, vector<64x32xbf16>,
    %9 = vector.extract_strided_slice %5 {offsets = [0, 32], sizes = [64, 32], strides = [1, 1]} : vector<64x96xf32> to vector<64x32xf32>
    %10 = arith.truncf %9 : vector<64x32xf32> to vector<64x32xbf16>
    %c0_7 = arith.constant 0 : index
    %c0_8 = arith.constant 0 : index
    %11 = vector.load %arg5[%c0_7, %c0_8] : memref<64x32xbf16, #tpu.memory_space<vmem>>, vector<64x32xbf16>
    tpu.vector_store %arg5[%c0_7, %c0_8], %10 {strides = array<i32>} : memref<64x32xbf16, #tpu.memory_space<vmem>>, vector<64x32xbf16>,
    %12 = vector.extract_strided_slice %5 {offsets = [0, 64], sizes = [64, 32], strides = [1, 1]} : vector<64x96xf32> to vector<64x32xf32>
    %13 = arith.truncf %12 : vector<64x32xf32> to vector<64x32xbf16>
    %c0_9 = arith.constant 0 : index
    %c0_10 = arith.constant 0 : index
    %14 = vector.load %arg6[%c0_9, %c0_10] : memref<64x32xbf16, #tpu.memory_space<vmem>>, vector<64x32xbf16>
    tpu.vector_store %arg6[%c0_9, %c0_10], %13 {strides = array<i32>} : memref<64x32xbf16, #tpu.memory_space<vmem>>, vector<64x32xbf16>,
    return
  }
  func.func @transform_0(%arg0: i32) -> (i32, i32) {
    %c0_i32 = arith.constant 0 : i32
    %c0_i32_0 = arith.constant 0 : i32
    return %arg0, %c0_i32 : i32, i32
  }
  func.func @transform_1(%arg0: i32) -> (i32, i32) {
    %c0_i32 = arith.constant 0 : i32
    %c0_i32_0 = arith.constant 0 : i32
    %c0_i32_1 = arith.constant 0 : i32
    return %c0_i32, %c0_i32_0 : i32, i32
  }
  func.func @transform_2(%arg0: i32) -> (i32, i32) {
    %c0_i32 = arith.constant 0 : i32
    %c0_i32_0 = arith.constant 0 : i32
    %c0_i32_1 = arith.constant 0 : i32
    return %c0_i32, %c0_i32_0 : i32, i32
  }
  func.func @transform_3(%arg0: i32) -> (i32, i32) {
    %c0_i32 = arith.constant 0 : i32
    %c0_i32_0 = arith.constant 0 : i32
    return %arg0, %c0_i32 : i32, i32
  }
  func.func @transform_4(%arg0: i32) -> (i32, i32) {
    %c0_i32 = arith.constant 0 : i32
    %c0_i32_0 = arith.constant 0 : i32
    return %arg0, %c0_i32 : i32, i32
  }
  func.func @transform_5(%arg0: i32) -> (i32, i32) {
    %c0_i32 = arith.constant 0 : i32
    %c0_i32_0 = arith.constant 0 : i32
    return %arg0, %c0_i32 : i32, i32
  }
}

</mosaic_0001>

<bundles_post_ra>
// kernel: tpu_custom_call.1
= control target key start
LH: loop header
LB: loop body
LE: loop exit
PB: predicated region body
PF: predicated region fallthrough
CT: control target
= control target key end

     0   :  { %s665_s18 = smov 0   ;;  %s763_s0 = inlined_call_operand.vmem [shape: bf16[256,32], index: 0, kind: input, shape index: {}]   ;;  %s764_s1 = inlined_call_operand.vmem [shape: bf16[32,96], index: 1, kind: input, shape index: {}]   ;;  %s765_s2 = inlined_call_operand.vmem [shape: f32[1,96], index: 2, kind: input, shape index: {}]   ;;  %s766_s3 = inlined_call_operand.vmem [shape: bf16[256,32], index: 3, kind: output, shape index: {0}]   ;;  %s767_s4 = inlined_call_operand.vmem [shape: bf16[256,32], index: 4, kind: output, shape index: {1}]   ;;  %s768_s5 = inlined_call_operand.vmem [shape: bf16[256,32], index: 5, kind: output, shape index: {2}]  }
   0x1 LB: > { %s559_s19 = sadd.s32 4294967295, %s631_s18   ;;  %p563_p0 = scmp.ge.s32.totalorder %s631_s18, 1  ;;  %s631_s18 = sphi %s665_s18, %s16_s18  }
   0x2   : > { %p193_p1 = scmp.lt.s32.totalorder %s631_s18, 5 }
   0x4   : > { %p194_p2 = pnand %p563_p0, %p193_p1 }
   0x5   : > { %s564_s22 = sshll.u32 (!%p194_p2), %s559_s19, 3  ;;  %s633_s9 = smov (!%p194_p2), 96  }
   0x6   : > { %197 = sbr.rel (%p194_p2) target bundleno = 306 (0x132), region = 32  ;;  %p232_p3 = scmp.lt.s32.totalorder (!%p194_p2), %s564_s22, 31 }
   0x7   : > { %s634_s10 = smov (!%p194_p2), 64  }
   0xb   : > { %v607_v0 = vld [vmem:[%s764_s1 + $0x8] sm:$0xff]  ;;  %v606_v1 = vld [vmem:[%s764_s1] sm:$0xff]  ;;  %s770_s22 = smov (!%p232_p3, %s564_s22), 31  ;;  %vm304_vm0 = vcmask 261120   ;;  %vm354_vm1 = vcmask 257024  }
   0xc   : > { %323 = vmatpush.bf16.msra.mxu0 %v607_v0  ;;  %608 = vmatpush.bf16.msra.mxu1 %v607_v0  ;;  %s679_s25 = sshll.u32 %s770_s22, 2  ;;  %v624_v6 = vld [vmem:[%s765_s2] ss:$0 sm:$0xff] }
   0xd   : > { %610 = vmatpush.bf16.msra.mxu3 %v607_v0  ;;  %609 = vmatpush.bf16.msra.mxu2 %v607_v0  ;;  %s235_s28 = scalar_lea.vmem %s763_s0, %s679_s25  ;;  %s692_s8 = scalar_lea.vmem %s766_s3, %s679_s25 }
   0xe   : > { %v602_v2 = vld [vmem:[%s235_s28] sm:$0xff]  ;;  %v603_v3 = vld [vmem:[%s235_s28 + $0x8] sm:$0xff]  ;;  %v605_v4 = vld [vmem:[%s235_s28 + $0x18] sm:$0xff]  ;;  %s730_s13 = scalar_lea.vmem %s768_s5, %s679_s25  ;;  %s247_s16 = scalar_lea.vmem %s767_s4, %s679_s25 }
   0xf   : > { %v604_v5 = vld [vmem:[%s235_s28 + $0x10] sm:$0xff] }
  0x10   : > { %324 = vmatpush.bf16.msra.mxu0 %v606_v1  ;;  %611 = vmatpush.bf16.msra.mxu1 %v606_v1 }
  0x11   : > { %613 = vmatpush.bf16.msra.mxu3 %v606_v1  ;;  %612 = vmatpush.bf16.msra.mxu2 %v606_v1 }
  0x13   : > { %596 = vmatmul.msk.bf16.vlgmr.msra.gmra.mxu0 %vm304_vm0, %v602_v2  ;;  %597 = vmatmul.msk.bf16.vlgmr.msra.gmra.mxu1 %vm304_vm0, %v603_v3 }
  0x14   : > { %599 = vmatmul.msk.bf16.vlgmr.msra.gmra.mxu3 %vm304_vm0, %v605_v4  ;;  %598 = vmatmul.msk.bf16.vlgmr.msra.gmra.mxu2 %vm304_vm0, %v604_v5 }
  0x90   : > { %v326_v7 = vpop.f32.mrf.mxu0  ;;  %v331_v8 = vpop.f32.mrf.mxu1 }
  0x91   : > { %v327_v9 = vadd.f32 %v624_v6, %v326_v7  ;;  %v332_v10 = vadd.f32 %v624_v6, %v331_v8 }
  0x93   : > { %v346_v11 = vpack.c.bf16 %v327_v9, %v327_v9  ;;  %v348_v12 = vpack.c.bf16 %v332_v10, %v332_v10 }
  0x95   : > { %355 = vst.msk [vmem:[%s692_s8] sm:$0xf] %vm354_vm1, %v346_v11  ;;  %375 = vrot.lane.b32.xlu1 %v348_v12, %s633_s9  ;;  %403 = vrot.lane.b32.xlu2 %v346_v11, %s634_s10 }
  0x96   : > { %357 = vst.msk [vmem:[%s692_s8 + $0x8] sm:$0xf] %vm354_vm1, %v348_v12  ;;  %371 = vrot.lane.b32.xlu0 %v346_v11, %s633_s9 }
  0x97   : > { %v341_v13 = vpop.f32.mrf.mxu3  ;;  %v336_v14 = vpop.f32.mrf.mxu2 }
  0x98   : > { %v342_v15 = vadd.f32 %v624_v6, %v341_v13  ;;  %v328_v16 = vpop.f32.mrf.mxu0  ;;  %v333_v17 = vpop.f32.mrf.mxu1  ;;  %v337_v18 = vadd.f32 %v624_v6, %v336_v14 }
  0x99   : > { %v329_v19 = vadd.f32 %v624_v6, %v328_v16  ;;  %v334_v20 = vadd.f32 %v624_v6, %v333_v17 }
  0x9a   : > { %v352_v21 = vpack.c.bf16 %v342_v15, %v342_v15  ;;  %v350_v22 = vpack.c.bf16 %v337_v18, %v337_v18 }
  0x9b   : > { %v347_v23 = vpack.c.bf16 %v329_v19, %v329_v19  ;;  %v349_v24 = vpack.c.bf16 %v334_v20, %v334_v20 }
  0x9c   : > { %361 = vst.msk [vmem:[%s692_s8 + $0x18] sm:$0xf] %vm354_vm1, %v352_v21 }
  0x9d   : > { %356 = vst.msk [vmem:[%s692_s8 + $0x4] sm:$0xf] %vm354_vm1, %v347_v23  ;;  %407 = vrot.lane.b32.xlu1 %v348_v12, %s634_s10  ;;  %379 = vrot.lane.b32.xlu2 %v350_v22, %s633_s9 }
  0x9e   : > { %358 = vst.msk [vmem:[%s692_s8 + $0xc] sm:$0xf] %vm354_vm1, %v349_v24  ;;  %383 = vrot.lane.b32.xlu0 %v352_v21, %s633_s9 }
  0x9f   : > { %359 = vst.msk [vmem:[%s692_s8 + $0x10] sm:$0xf] %vm354_vm1, %v350_v22  ;;  %v343_v25 = vpop.f32.mrf.mxu3  ;;  %v338_v26 = vpop.f32.mrf.mxu2 }
  0xa0   : > { %v344_v27 = vadd.f32 %v624_v6, %v343_v25  ;;  %v339_v28 = vadd.f32 %v624_v6, %v338_v26 }
  0xa2   : > { %v353_v29 = vpack.c.bf16 %v344_v27, %v344_v27  ;;  %v351_v30 = vpack.c.bf16 %v339_v28, %v339_v28 }
  0xa4   : > { %362 = vst.msk [vmem:[%s692_s8 + $0x1c] sm:$0xf] %vm354_vm1, %v353_v29 }
  0xa5   : > { %360 = vst.msk [vmem:[%s692_s8 + $0x14] sm:$0xf] %vm354_vm1, %v351_v30  ;;  %377 = vrot.lane.b32.xlu1 %v349_v24, %s633_s9  ;;  %409 = vrot.lane.b32.xlu2 %v349_v24, %s634_s10 }
  0xa6   : > { %411 = vrot.lane.b32.xlu0 %v350_v22, %s634_s10 }
  0xad   : > { %385 = vrot.lane.b32.xlu1 %v353_v29, %s633_s9  ;;  %381 = vrot.lane.b32.xlu2 %v351_v30, %s633_s9 }
  0xae   : > { %373 = vrot.lane.b32.xlu0 %v347_v23, %s633_s9 }
  0xb5   : > { %413 = vrot.lane.b32.xlu1 %v351_v30, %s634_s10  ;;  %415 = vrot.lane.b32.xlu2 %v352_v21, %s634_s10 }
  0xb6   : > { %405 = vrot.lane.b32.xlu0 %v347_v23, %s634_s10 }
  0xbe   : > { %417 = vrot.lane.b32.xlu0 %v353_v29, %s634_s10 }
  0xef   : > { %v404_v31 = vpop.permute.xlu2 %403 }
  0xf0   : > { %427 = vst.msk [vmem:[%s730_s13] sm:$0xf] %vm354_vm1, %v404_v31 }
  0xf7   : > { %v380_v32 = vpop.permute.xlu2 %379 }
  0xf8   : > { %399 = vst.msk [vmem:[%s247_s16 + $0x10] sm:$0xf] %vm354_vm1, %v380_v32 }
  0xff   : > { %v410_v33 = vpop.permute.xlu2 %409 }
 0x100   : > { %430 = vst.msk [vmem:[%s730_s13 + $0xc] sm:$0xf] %vm354_vm1, %v410_v33 }
 0x107   : > { %v376_v34 = vpop.permute.xlu1 %375  ;;  %v382_v35 = vpop.permute.xlu2 %381 }
 0x108   : > { %397 = vst.msk [vmem:[%s247_s16 + $0x8] sm:$0xf] %vm354_vm1, %v376_v34  ;;  %v372_v36 = vpop.permute.xlu0 %371 }
 0x109   : > { %400 = vst.msk [vmem:[%s247_s16 + $0x14] sm:$0xf] %vm354_vm1, %v382_v35 }
 0x10a   : > { %395 = vst.msk [vmem:[%s247_s16] sm:$0xf] %vm354_vm1, %v372_v36 }
 0x10f   : > { %v408_v37 = vpop.permute.xlu1 %407  ;;  %v416_v38 = vpop.permute.xlu2 %415 }
 0x110   : > { %429 = vst.msk [vmem:[%s730_s13 + $0x8] sm:$0xf] %vm354_vm1, %v408_v37  ;;  %v384_v39 = vpop.permute.xlu0 %383 }
 0x111   : > { %433 = vst.msk [vmem:[%s730_s13 + $0x18] sm:$0xf] %vm354_vm1, %v416_v38 }
 0x112   : > { %401 = vst.msk [vmem:[%s247_s16 + $0x18] sm:$0xf] %vm354_vm1, %v384_v39 }
 0x117   : > { %v378_v40 = vpop.permute.xlu1 %377 }
 0x118   : > { %398 = vst.msk [vmem:[%s247_s16 + $0xc] sm:$0xf] %vm354_vm1, %v378_v40  ;;  %v412_v41 = vpop.permute.xlu0 %411 }
 0x119   : > { %431 = vst.msk [vmem:[%s730_s13 + $0x10] sm:$0xf] %vm354_vm1, %v412_v41 }
 0x11f   : > { %v386_v42 = vpop.permute.xlu1 %385 }
 0x120   : > { %402 = vst.msk [vmem:[%s247_s16 + $0x1c] sm:$0xf] %vm354_vm1, %v386_v42  ;;  %v374_v43 = vpop.permute.xlu0 %373 }
 0x121   : > { %396 = vst.msk [vmem:[%s247_s16 + $0x4] sm:$0xf] %vm354_vm1, %v374_v43 }
 0x127   : > { %v414_v44 = vpop.permute.xlu1 %413 }
 0x128   : > { %432 = vst.msk [vmem:[%s730_s13 + $0x14] sm:$0xf] %vm354_vm1, %v414_v44  ;;  %v406_v45 = vpop.permute.xlu0 %405 }
 0x129   : > { %428 = vst.msk [vmem:[%s730_s13 + $0x4] sm:$0xf] %vm354_vm1, %v406_v45 }
 0x130   : > { %v418_v46 = vpop.permute.xlu0 %417 }
 0x131   : > { %434 = vst.msk [vmem:[%s730_s13 + $0x1c] sm:$0xf] %vm354_vm1, %v418_v46 }
 0x132 PF: > { %s16_s18 = sadd.s32 1, %s631_s18  }
 0x133   : > { %p13_p4 = scmp.ge.s32.totalorder %s16_s18, 6  }
 0x135   :  { %15 = sbr.rel (!%p13_p4) target bundleno = 1 (0x1), region = 86 }

</bundles_post_ra>
